<compile_context>
chip_gen: v6e
topology: v6e:2x2x1
jax: 0.10.0
libtpu: 0.0.40
codegen_flags: <defaults>
</compile_context>

<pallas_src>
import jax
import jax.numpy as jnp
from jax.experimental import pallas as pl
from jax.experimental.pallas import tpu as pltpu


def _round_up(x, m):
    return (x + m - 1) // m * m


def _patch_embed_kernel(x_ref, w_ref, b_ref, o_ref):
    # x_ref: (TM, K)     streamed patch-matrix tile (compute dtype)
    # w_ref: (K, E_pad)  reshaped conv weight (resident across the grid)
    # b_ref: (1, E)      conv bias, f32 (resident)
    # o_ref: (TM, E)     output tile (out dtype)
    e = o_ref.shape[-1]
    acc = jnp.dot(x_ref[...], w_ref[...], preferred_element_type=jnp.float32)
    o_ref[...] = (acc[:, :e] + b_ref[...]).astype(o_ref.dtype)


def _choose_tm(m, tm_max):
    """M-tile: multiple of 8; prefer dividing M (no pad / no post-slice) and
    a grid of >= 2 steps (v7x megacore balance)."""
    tm_max = max(8, (tm_max // 8) * 8)          # defensive: multiple of 8
    if m <= tm_max:
        if m % 16 == 0 and m // 2 >= 8:
            return m // 2                        # grid of 2, no padding
        return _round_up(m, 8)                   # single step (tiny M)
    for cand in range(tm_max, 63, -8):           # largest mult-of-8 divisor
        if m % cand == 0:
            return cand
    return tm_max                                # fall back: pad M


def patch_embed_forward(x, weight, bias, patch_size, *,
                        compute_dtype=jnp.bfloat16, out_dtype=None,
                        tm_max=1024, x_buffer_count=2):
    """x: (B, C, H, W) NCHW; weight: (E, C, ph, pw); bias: (E,).

    Returns (B, num_patches, E) in `out_dtype` (default: compute_dtype)."""
    B, C, H, W = x.shape
    ph, pw = patch_size
    assert H % ph == 0 and W % pw == 0, "image size must be divisible by patch"
    E = weight.shape[0]
    Hp, Wp = H // ph, W // pw
    num_patches = Hp * Wp
    K = C * ph * pw
    M = B * num_patches
    out_dtype = compute_dtype if out_dtype is None else out_dtype

    cb = jnp.dtype(compute_dtype).itemsize
    ob = jnp.dtype(out_dtype).itemsize
    E_pad = _round_up(E, 128)            # resident weight only (lane-dense MXU)

    # --- tile selection under an explicit VMEM budget -----------------------
    resident = 2 * K * E_pad * cb + 2 * E * 4            # weight + bias blocks
    per_row = x_buffer_count * K * cb + 2 * E * ob       # streamed buffers/row
    buf_budget = 24 << 20                                 # working-set cap
    tm_cap = max(8, ((buf_budget - resident) // per_row) // 8 * 8)
    TM = _choose_tm(M, min(tm_max, tm_cap))
    M_pad = _round_up(M, TM)
    grid = (M_pad // TM,)

    vmem_need = resident + TM * per_row
    vmem_limit = int(min(56 << 20, max(2 * vmem_need + (8 << 20), 32 << 20)))

    # --- glue: patch extraction + weight reshape (plain JAX) ----------------
    # (B,C,Hp,ph,Wp,pw) -> (B,Hp,Wp,C,ph,pw) -> (M,K); XLA fuses this into a
    # single transpose+cast copy (the pads below are no-ops when TM | M).
    # TODO(synk): this is still one extra HBM write+read of the input (im2col).
    # Folding it into the kernel needs either a lane-strided gather or a
    # rank-4 (C,ph,Wp,pw)->(Wp,C,ph,pw) transpose on the VMEM tile, and a
    # per-(c,i) DMA scatter would have only pw*itemsize-byte contiguous runs;
    # none of these lower/perform well in Mosaic today.  Revisit if the
    # upstream model can hand us a pre-im2col'd (B, num_patches, K) layout.
    xp = x.reshape(B, C, Hp, ph, Wp, pw)
    xp = jnp.transpose(xp, (0, 2, 4, 1, 3, 5)).reshape(M, K).astype(compute_dtype)
    if M_pad != M:
        xp = jnp.pad(xp, ((0, M_pad - M), (0, 0)))

    wk = weight.reshape(E, K).T                                      # (K, E)
    wk = jnp.pad(wk, ((0, 0), (0, E_pad - E))).astype(compute_dtype)
    bk = bias.astype(jnp.float32).reshape(1, E)

    cost = pl.CostEstimate(
        flops=2 * M_pad * K * E_pad,
        transcendentals=0,
        bytes_accessed=(M_pad * K * cb          # streamed patch matrix
                        + K * E_pad * cb        # resident weight
                        + M_pad * E * ob))      # output writeback

    if x_buffer_count == 2:
        x_spec = pl.BlockSpec((TM, K), lambda i: (i, 0))
    else:  # sweepable: deeper pipelining if the X DMA is exposed (review #9)
        x_spec = pl.BlockSpec((TM, K), lambda i: (i, 0),
                              pipeline_mode=pl.Buffered(x_buffer_count))

    out = pl.pallas_call(
        _patch_embed_kernel,
        out_shape=jax.ShapeDtypeStruct((M_pad, E), out_dtype),
        grid_spec=pltpu.PrefetchScalarGridSpec(
            num_scalar_prefetch=0,
            grid=grid,
            in_specs=[
                x_spec,                                        # X tiles stream
                pl.BlockSpec((K, E_pad), lambda i: (0, 0)),    # weight resident
                pl.BlockSpec((1, E), lambda i: (0, 0)),        # bias resident
            ],
            out_specs=pl.BlockSpec((TM, E), lambda i: (i, 0)),
        ),
        compiler_params=pltpu.CompilerParams(
            dimension_semantics=("parallel",),
            vmem_limit_bytes=vmem_limit),
        cost_estimate=cost,
    )(xp, wk, bk)

    if M_pad != M:
        out = out[:M]
    # TODO(synk): norm_layer is None in the module default; a fused LayerNorm
    # epilogue could be added to the kernel if a norm_layer is configured.
    return out.reshape(B, num_patches, E)


if __name__ == "__main__":
    # Small shapes consistent with the module: img_size=16, patch_size=4,
    # in_chans=4, embed_dim=32, batch=2.  norm_layer=None (module default).
    B, C, H, W = 2, 4, 16, 16
    ph = pw = 4
    E = 32

    key = jax.random.PRNGKey(0)
    kx, kw, kb = jax.random.split(key, 3)
    x = jax.random.normal(kx, (B, C, H, W), dtype=jnp.float32)
    weight = jax.random.normal(kw, (E, C, ph, pw), dtype=jnp.float32) * 0.02
    bias = jax.random.normal(kb, (E,), dtype=jnp.float32) * 0.02

    # XLA conv reference (same semantics as nn.Conv2d + flatten(2).transpose).
    ref = jax.lax.conv_general_dilated(
        x, weight, window_strides=(ph, pw), padding="VALID",
        dimension_numbers=("NCHW", "OIHW", "NCHW"))
    ref = ref + bias[None, :, None, None]
    ref = ref.reshape(B, E, -1).transpose(0, 2, 1)

    # Default path: bf16 operands + bf16 output, f32 accumulation.
    out_bf16 = patch_embed_forward(x, weight, bias, (ph, pw))
    out_bf16 = jax.block_until_ready(out_bf16)
    assert out_bf16.shape == (B, (H // ph) * (W // pw), E)
    assert out_bf16.dtype == jnp.bfloat16
    assert jnp.allclose(out_bf16.astype(jnp.float32), ref, atol=3e-2, rtol=3e-2)

    # f32 compute + f32 output: bit-tight agreement with the conv reference.
    out_f32 = patch_embed_forward(x, weight, bias, (ph, pw),
                                  compute_dtype=jnp.float32,
                                  out_dtype=jnp.float32)
    out_f32 = jax.block_until_ready(out_f32)
    assert jnp.allclose(out_f32, ref, atol=1e-4, rtol=1e-4)

    print("KERNEL_OK")
</pallas_src>

<mosaic_0001>
module attributes {stable_mosaic.version = 11 : i64} {
  func.func @_patch_embed_kernel(%arg0: i32, %arg1: memref<16x64xbf16, #tpu.memory_space<vmem>>, %arg2: memref<64x128xbf16, #tpu.memory_space<vmem>>, %arg3: memref<1x32xf32, #tpu.memory_space<vmem>>, %arg4: memref<16x32xbf16, #tpu.memory_space<vmem>>) attributes {dimension_semantics = [#tpu.dimension_semantics<parallel>], iteration_bounds = array<i64: 2>, scalar_prefetch = 0 : i64, scratch_operands = 0 : i64, tpu.core_type = #tpu.core_type<tc>, window_params = [{transform_indices = @transform_0, window_bounds = array<i64: 16, 64>}, {pipeline_mode = #tpu.pipeline_mode<synchronous>, transform_indices = @transform_1, window_bounds = array<i64: 64, 128>}, {pipeline_mode = #tpu.pipeline_mode<synchronous>, transform_indices = @transform_2, window_bounds = array<i64: 1, 32>}, {transform_indices = @transform_3, window_bounds = array<i64: 16, 32>}]} {
    %c0 = arith.constant 0 : index
    %c0_0 = arith.constant 0 : index
    %0 = vector.load %arg1[%c0, %c0_0] : memref<16x64xbf16, #tpu.memory_space<vmem>>, vector<16x64xbf16>
    %c0_1 = arith.constant 0 : index
    %c0_2 = arith.constant 0 : index
    %1 = vector.load %arg2[%c0_1, %c0_2] : memref<64x128xbf16, #tpu.memory_space<vmem>>, vector<64x128xbf16>
    %cst = arith.constant dense<0.000000e+00> : vector<16x128xf32>
    %2 = tpu.matmul %0, %1, %cst {dimension_numbers = #tpu.dot_dimension_numbers<[1], [0], [0], [1], [0, 0, 1, 1], [], []>} : vector<16x64xbf16>, vector<64x128xbf16>, vector<16x128xf32> -> vector<16x128xf32>
    %3 = vector.extract_strided_slice %2 {offsets = [0, 0], sizes = [16, 32], strides = [1, 1]} : vector<16x128xf32> to vector<16x32xf32>
    %c0_3 = arith.constant 0 : index
    %c0_4 = arith.constant 0 : index
    %4 = vector.load %arg3[%c0_3, %c0_4] : memref<1x32xf32, #tpu.memory_space<vmem>>, vector<1x32xf32>
    %5 = vector.broadcast %4 : vector<1x32xf32> to vector<16x32xf32>
    %6 = arith.addf %3, %5 : vector<16x32xf32>
    %7 = arith.truncf %6 : vector<16x32xf32> to vector<16x32xbf16>
    %c0_5 = arith.constant 0 : index
    %c0_6 = arith.constant 0 : index
    %8 = vector.load %arg4[%c0_5, %c0_6] : memref<16x32xbf16, #tpu.memory_space<vmem>>, vector<16x32xbf16>
    tpu.vector_store %arg4[%c0_5, %c0_6], %7 {strides = array<i32>} : memref<16x32xbf16, #tpu.memory_space<vmem>>, vector<16x32xbf16>,
    return
  }
  func.func @transform_0(%arg0: i32) -> (i32, i32) {
    %c0_i32 = arith.constant 0 : i32
    %c0_i32_0 = arith.constant 0 : i32
    return %arg0, %c0_i32 : i32, i32
  }
  func.func @transform_1(%arg0: i32) -> (i32, i32) {
    %c0_i32 = arith.constant 0 : i32
    %c0_i32_0 = arith.constant 0 : i32
    %c0_i32_1 = arith.constant 0 : i32
    return %c0_i32, %c0_i32_0 : i32, i32
  }
  func.func @transform_2(%arg0: i32) -> (i32, i32) {
    %c0_i32 = arith.constant 0 : i32
    %c0_i32_0 = arith.constant 0 : i32
    %c0_i32_1 = arith.constant 0 : i32
    return %c0_i32, %c0_i32_0 : i32, i32
  }
  func.func @transform_3(%arg0: i32) -> (i32, i32) {
    %c0_i32 = arith.constant 0 : i32
    %c0_i32_0 = arith.constant 0 : i32
    return %arg0, %c0_i32 : i32, i32
  }
}

</mosaic_0001>

<bundles_post_ra>
// kernel: tpu_custom_call.1
= control target key start
LH: loop header
LB: loop body
LE: loop exit
PB: predicated region body
PF: predicated region fallthrough
CT: control target
= control target key end

     0   :  { %8 = vsyncpa [#allocation3], 0  ;;  %s865_s0 = inlined_call_operand.hbm [shape: bf16[32,64], index: 0, kind: input, shape index: {}]   ;;  %s866_s1 = inlined_call_operand.hbm [shape: bf16[64,128], index: 1, kind: input, shape index: {}]   ;;  %s867_s2 = inlined_call_operand.vmem [shape: f32[1,32], index: 2, kind: input, shape index: {}]   ;;  %s868_s3 = inlined_call_operand.hbm [shape: bf16[32,32], index: 3, kind: output, shape index: {}]  }
   0x1   :  { %10 = vsyncpa [#allocation3 + $0x1], 0 }
   0x2   :  { %11 = vsyncpa [#allocation6], 0 }
   0x3   :  { %12 = vsyncpa [#allocation4], 0 }
   0x4   :  { %14 = vsyncpa [#allocation4 + $0x1], 0  ;;  %s675_s12 = smov 0   ;;  %s677_s13 = smov 0  }
   0x5   :  { %s679_s14 = smov 0   ;;  %s681_s15 = smov 0  }
   0x6 LB: > { %s696_s16 = sadd.s32 4294967295, %s644_s15   ;;  %s408_s17 = sadd.s32 4294967294, %s644_s15   ;;  %s644_s15 = sphi %s681_s15, %s890_s15   ;;  %s640_s14 = sphi %s679_s14, %s889_s14   ;;  %s636_s13 = sphi %s677_s13, %s888_s13   ;;  %s632_s12 = sphi %s675_s12, %s887_s12  }
   0x7   : > { %p40_p0 = scmp.ne.s32.totalorder %s636_s13, %s632_s12  ;;  %p869_p1 = scmp.eq.s32.totalorder %s696_s16, 0 }
   0x8   : > { %p112_p3 = scmp.eq.s32.totalorder %s408_s17, 1  ;;  %p409_p5 = scmp.ge.s32.totalorder %s644_s15, 1 }
   0x9   : > { %p705_p4 = por %p869_p1, %p40_p0  ;;  %p119_p7 = scmp.lt.s32.totalorder %s644_s15, 3 }
   0xa   : > { %p710_p6 = por %p112_p3, %p40_p0  ;;  %s646_s21 = smov [#allocation5]  }
   0xb   : > { %s873_s18 = scalar_select %p705_p4, 1, 0 }
   0xc   : > { %s874_s19 = scalar_select %p710_p6, 1, 0 }
   0xd   : > { %p715_p8 = pnand %p409_p5, %p119_p7  ;;  %s131_s22 = sshll.u32 %s646_s21, 4  ;;  %s132_s22 = int_to_ptr.vmem [resolvable:$true] %s131_s22 }
   0xe   : > { %s729_s24 = sadd.s32 1, %s644_s15   ;;  %s27_s25 = sadd.s32 1, %s640_s14 }
   0xf   : > { %s875_s20 = scalar_select %p715_p8, 1, 0 }
  0x10   : > { %p462_p9 = pneg %p715_p8  ;;  %s24_s26 = ssub.s32 %s644_s15, %s729_s24 }
  0x11   : > { %s533_s27 = scalar_lea.vmem %s132_s22, 512  ;;  %p541_p5 = scmp.lt.s32.totalorder %s132_s22, %s132_s22 }
  0x12   : > { %p724_p11 = pnand %p462_p9, %p869_p1  ;;  %p534_p13 = scmp.ne.s32.totalorder %s132_s22, %s533_s27 }
  0x13   : > { %p542_p7 = scmp.lt.s32.totalorder %s533_s27, %s533_s27 }
  0x14   : > { %p524_p12 = pneg %p724_p11 }
  0x15   : > { %p543_p10 = por %p542_p7, %p541_p5 }
  0x16   : > { %p536_p0 = pnand %p534_p13, %p524_p12 }
  0x18   : > { %p537_p3 = pneg %p536_p0 }
  0x1a   : > { %p544_p2 = pnand %p543_p10, %p537_p3 }
  0x1c   : > { %547 = shalt.err (!%p544_p2)
}
  0x1d   : > { %s647_s28 = smov 64   ;;  %s648_s29 = smov 4  }
  0x1e   : > { %465 = dma.hbm_to_vmem [thread:$0]  (!%p724_p11), %s866_s1, 512, %s132_s22, [#allocation6], %s647_s28, %s647_s28, %s648_s29  }
  0x1f   : > { %p25_p2 = scmp.eq.s32.totalorder %s24_s26, 0  ;;  %p34_p9 = scmp.ne.s32.totalorder %s640_s14, %s636_s13 }
  0x20   : > { %p35_p10 = scmp.eq.s32.totalorder %s644_s15, 0  ;;  %p475_p12 = scmp.lt.s32.totalorder %s644_s15, 2 }
  0x21   : > { %s749_s5 = scalar_select %p25_p2, %s640_s14, %s27_s25  }
  0x22   : > { %p36_p13 = por %p35_p10, %p34_p9  ;;  %p877_p0 = scmp.eq.s32.totalorder %s696_s16, 1 }
  0x23   : > { %s148_s7 = sand.u32 1, %s640_s14   ;;  %s433_s8 = sshll.u32 %s644_s15, 7 }
  0x24   : > { %p753_p3 = por %p877_p0, %p34_p9  ;;  %s412_s9 = sshll.u32 %s148_s7, 3 }
  0x25   : > { %s762_s17 = scalar_lea.hbm %s865_s0, %s433_s8  ;;  %s152_s21 = scalar_lea.vmem [#allocation2], %s412_s9 }
  0x26   : > { %s878_s6 = scalar_select %p753_p3, 1, 0 }
  0x27   : > { %s159_s22 = sshll.u32 %s152_s21, 4  ;;  %p764_p11 = pnand %p475_p12, %p36_p13  ;;  %s768_s22 = int_to_ptr.vmem [resolvable:$true] %s159_s22 }
  0x28   : > { %s770_s25 = scalar_lea.sflag [#allocation3], %s148_s7  ;;  %s548_s26 = scalar_lea.hbm %s762_s17, 128 }
  0x29   : > { %p549_p5 = scmp.ne.s32.totalorder %s762_s17, %s548_s26  ;;  %p550_p7 = pneg %p764_p11 }
  0x2a   : > { %s553_s4 = scalar_lea.hbm %s865_s0, 256  ;;  %p554_p10 = scmp.lt.s32.totalorder %s762_s17, %s865_s0 }
  0x2b   : > { %p551_p2 = pnand %p550_p7, %p549_p5  ;;  %p555_p12 = scmp.lt.s32.totalorder %s553_s4, %s548_s26 }
  0x2d   : > { %p552_p9 = pneg %p551_p2  ;;  %p556_p13 = por %p555_p12, %p554_p10 }
  0x2f   : > { %p557_p0 = pnand %p556_p13, %p552_p9 }
  0x31   : > { %560 = shalt.err (!%p557_p0)
}
  0x32   : > { %s561_s7 = scalar_lea.vmem %s768_s22, 128  ;;  %s649_s10 = smov [#allocation2]  }
  0x33   : > { %p562_p1 = scmp.ne.s32.totalorder %s768_s22, %s561_s7  ;;  %s566_s11 = sshll.u32 %s649_s10, 4  ;;  %s567_s11 = int_to_ptr.vmem [resolvable:$false] %s566_s11 }
  0x34   : > { %s568_s21 = scalar_lea.vmem %s567_s11, 256  ;;  %p569_p2 = scmp.lt.s32.totalorder %s768_s22, %s567_s11 }
  0x35   : > { %p564_p6 = pnand %p562_p1, %p550_p7  ;;  %p570_p3 = scmp.lt.s32.totalorder %s568_s21, %s561_s7 }
  0x37   : > { %p565_p5 = pneg %p564_p6  ;;  %p571_p4 = por %p570_p3, %p569_p2 }
  0x39   : > { %p572_p8 = pnand %p571_p4, %p565_p5 }
  0x3b   : > { %575 = shalt.err (!%p572_p8)
}
  0x3c   : > { %469 = dma.hbm_to_vmem [thread:$0]  (!%p764_p11), %s762_s17, 128, %s768_s22, %s770_s25, %s647_s28, %s647_s28, %s648_s29  }
  0x3d   : > { %p880_p1 = scmp.ne.s32.totalorder %s875_s20, 0 }
  0x3e   : > { %s797_s26 = sand.u32 (!%p880_p1), 1, %s636_s13   ;;  %p881_p4 = scmp.ne.s32.totalorder (!%p880_p1), %s873_s18, 0 }
  0x3f   : > { %171 = sbr.rel (%p880_p1) target bundleno = 304 (0x130), region = 32  ;;  %s416_s27 = sshll.u32 (!%p880_p1), %s797_s26, 3 }
  0x40   : > { %s174_s30 = scalar_lea.sflag (!%p880_p1), [#allocation3], %s797_s26  ;;  %s177_s23 = scalar_lea.vmem (!%p880_p1), [#allocation2], %s416_s27 }
  0x44   : > { %619 = dma.done.wait (%p881_p4), %s174_s30, 128  }
  0x45   : > { %621 = vsyncadd (%p881_p4), %s174_s30, 4294967168  ;;  %p882_p6 = scmp.eq.s32.totalorder %s696_s16, 0 }
  0x47   : > { %623 = dma.done.wait (%p882_p6), [#allocation6], 512   ;;  %p883_p8 = pmov %p882_p6 }
  0x48   : > { %v650_v0 = vmov 0.0   ;;  %vm651_vm0 = vmmov 0   ;;  %v517_v1 = vld [vmem:[#allocation5 + $0x18] sm:$0xff]   ;;  %v518_v2 = vld [vmem:[#allocation5 + $0x10] sm:$0xff]   ;;  %v519_v3 = vld [vmem:[#allocation5 + $0x8] sm:$0xff]   ;;  %vm246_vm1 = vcmask 523264  }
  0x49   : > { %625 = vsyncadd (%p883_p8), [#allocation6], 4294966784  ;;  %442 = vmatprep.subr.bf16.mxu0 %v650_v0  ;;  %450 = vmatprep.mubr.msk.bf16.mxu0 %vm651_vm0, %v650_v0  ;;  %v520_v4 = vld [vmem:[#allocation5] sm:$0xff]   ;;  %v521_v5 = vld [vmem:[%s177_s23] sm:$0xff]   ;;  %vm308_vm2 = vcmask 257024   ;;  %s203_s28 = scalar_lea.vmem [#allocation7], %s416_s27 }
  0x4a   : > { %443 = vmatpush3.bf16.msra.mxu0 %v517_v1  ;;  %v425_v6 = vld [vmem:[%s867_s2] ss:$0 sm:$0xff]  ;;  %s325_s29 = sshll.u32 %s203_s28, 4  ;;  %s436_s17 = sshll.u32 %s696_s16, 7  ;;  %s822_s29 = int_to_ptr.vmem [resolvable:$true] %s325_s29 }
  0x4b   : > { %444 = vmatprep.subr.bf16.mxu0 %v650_v0  ;;  %s820_s4 = scalar_lea.hbm %s868_s3, %s436_s17  ;;  %s312_s8 = scalar_lea.sflag [#allocation4], %s797_s26 }
  0x4c   : > { %s576_s9 = scalar_lea.vmem %s822_s29, 128  ;;  %p884_p11 = scmp.ne.s32.totalorder %s878_s6, 0 }
  0x4d   : > { %p577_p3 = scmp.ne.s32.totalorder %s822_s29, %s576_s9  ;;  %s652_s16 = smov [#allocation7]  }
  0x4e   : > { %445 = vmatpush3.bf16.msra.mxu0 %v518_v2  ;;  %s580_s7 = sshll.u32 %s652_s16, 4  ;;  %s581_s7 = int_to_ptr.vmem [resolvable:$false] %s580_s7 }
  0x4f   : > { %446 = vmatprep.subr.bf16.mxu0 %v650_v0  ;;  %p578_p7 = pnand %p577_p3, %p884_p11  ;;  %s582_s10 = scalar_lea.vmem %s581_s7, 256 }
  0x50   : > { %p583_p10 = scmp.lt.s32.totalorder %s822_s29, %s581_s7  ;;  %p584_p12 = scmp.lt.s32.totalorder %s582_s10, %s576_s9 }
  0x51   : > { %p579_p9 = pneg %p578_p7 }
  0x52   : > { %447 = vmatpush3.bf16.msra.mxu0 %v519_v3  ;;  %p585_p13 = por %p584_p12, %p583_p10 }
  0x53   : > { %448 = vmatprep.subr.bf16.mxu0 %v650_v0 }
  0x54   : > { %p586_p0 = pnand %p585_p13, %p579_p9 }
  0x56   : > { %449 = vmatpush3.bf16.msra.mxu0 %v520_v4 }
  0x59   : > { %451 = vmatmul.mubr.msk.bf16.vlgmr.msra.gmra.mxu0 %vm246_vm1, %v521_v5 }
 0x119   : > { %v284_v7 = vpop.f32.mrf.mxu0 }
 0x11a   : > { %v298_v8 = vadd.f32 %v425_v6, %v284_v7 }
 0x11b   : > { %v452_v9 = vpop.f32.mrf.mxu0 }
 0x11c   : > { %v434_v10 = vpack.c.bf16 %v298_v8, %v298_v8 }
 0x11d   : > { %v287_v11 = vpop.f32.mrf.mxu0 }
 0x11e   : > { %309 = vst.msk [vmem:[%s203_s28] sm:$0xf] %vm308_vm2, %v434_v10  ;;  %v299_v12 = vadd.f32 %v425_v6, %v287_v11 }
 0x11f   : > { %v453_v13 = vpop.f32.mrf.mxu0 }
 0x120   : > { %v435_v14 = vpack.c.bf16 %v299_v12, %v299_v12 }
 0x122   : > { %310 = vst.msk [vmem:[%s203_s28 + $0x4] sm:$0xf] %vm308_vm2, %v435_v14 }
 0x123   : > { %589 = shalt.err (!%p586_p0)
}
 0x124   : > { %s590_s11 = scalar_lea.hbm %s820_s4, 128  ;;  %s594_s30 = scalar_lea.hbm %s868_s3, 256 }
 0x125   : > { %p591_p5 = scmp.ne.s32.totalorder %s820_s4, %s590_s11  ;;  %p595_p4 = scmp.lt.s32.totalorder %s820_s4, %s868_s3 }
 0x126   : > { %p596_p6 = scmp.lt.s32.totalorder %s594_s30, %s590_s11 }
 0x127   : > { %p592_p2 = pnand %p591_p5, %p884_p11 }
 0x128   : > { %p597_p8 = por %p596_p6, %p595_p4 }
 0x129   : > { %p593_p1 = pneg %p592_p2 }
 0x12b   : > { %p598_p3 = pnand %p597_p8, %p593_p1 }
 0x12d   : > { %601 = shalt.err (!%p598_p3)
}
 0x12e   : > { %s653_s20 = smov 64   ;;  %s654_s28 = smov 4  }
 0x12f   : > { %460 = dma.vmem_to_hbm [thread:$0]  (%p884_p11), %s822_s29, 128, %s820_s4, %s312_s8, %s653_s20, %s653_s20, %s654_s28  }
 0x130 PF: > { %s340_s17 = sand.u32 1, %s632_s12   ;;  %p885_p7 = scmp.ne.s32.totalorder %s874_s19, 0 }
 0x131   : > { %p886_p9 = scmp.ge.s32.totalorder %s644_s15, 2  ;;  %s341_s22 = scalar_lea.sflag [#allocation4], %s340_s17 }
 0x133   : > { %p471_p10 = pnand %p886_p9, %p885_p7 }
 0x135   : > { %p472_p12 = pneg %p471_p10 }
 0x137   : > { %627 = dma.done.wait (%p472_p12), %s341_s22, 128  }
 0x138   : > { %629 = vsyncadd (%p472_p12), %s341_s22, 4294967168  ;;  %p17_p13 = scmp.ge.s32.totalorder %s729_s24, 4   ;;  %s887_s12 = smov %s636_s13 }
 0x139   : > { %s888_s13 = smov %s640_s14  ;;  %s889_s14 = smov %s749_s5 }
 0x13a   : > { %s890_s15 = smov %s729_s24  ;;  %19 = sbr.rel (!%p17_p13) target bundleno = 6 (0x6), region = 81 }
 0x13f   :  { %346 = vsyncpa [#allocation3], 1 }
 0x140   :  { %348 = vsyncpa [#allocation3 + $0x1], 1 }
 0x141   :  { %349 = vsyncpa [#allocation6], 1 }
 0x142   :  { %350 = vsyncpa [#allocation4], 1 }
 0x143   :  { %352 = vsyncpa [#allocation4 + $0x1], 1 }

</bundles_post_ra>
